<compile_context>
chip_gen: v5e
topology: v5e:2x2
jax: 0.10.0
libtpu: 0.0.40
codegen_flags: <defaults>
</compile_context>

<pallas_src>
import functools

import jax
import jax.numpy as jnp
from jax import lax
from jax.experimental import pallas as pl
from jax.experimental.pallas import tpu as pltpu

NUM_CLASSES = 4
LANES = 128


def _cdiv(a: int, b: int) -> int:
    return (a + b - 1) // b


def _ce_sum_kernel(logits_ref, labels_ref, out_ref, *,
                   n_tiles: int, tiles_per_split: int, rem_rows: int):
    """Accumulates per-(row,lane)-slot partial sums of the CE loss.

    logits_ref: (4, R, 128)  class-major logits tile (any float dtype)
    labels_ref: (R, 128)     integer labels tile
    out_ref:    (1, R, 128)  f32 per-slot partial sums for this split
    """
    p = pl.program_id(0)            # split (TensorCore shard on v7x)
    k = pl.program_id(1)            # tile within the split
    g = p * tiles_per_split + k     # global tile index (may overhang n_tiles)

    @pl.when(k == 0)
    def _init():
        out_ref[...] = jnp.zeros_like(out_ref)

    x = logits_ref[...].astype(jnp.float32)        # (4, R, 128)
    labels = labels_ref[...].astype(jnp.int32)     # (R, 128)

    r0, r1, r2, r3 = x[0], x[1], x[2], x[3]        # dense (R, 128) each
    # Numerically stable logsumexp over the 4 class planes: pure VPU/EUP work.
    m = jnp.maximum(jnp.maximum(r0, r1), jnp.maximum(r2, r3))
    s0, s1, s2, s3 = r0 - m, r1 - m, r2 - m, r3 - m
    sum_exp = jnp.exp(s0) + jnp.exp(s1) + jnp.exp(s2) + jnp.exp(s3)
    # Pick the (already shifted) logit at the label with 3 selects; labels
    # outside [0, 3] fall through to class 3.
    picked = jnp.where(labels == 0, s0,
             jnp.where(labels == 1, s1,
             jnp.where(labels == 2, s2, s3)))
    per_example = jnp.log(sum_exp) - picked        # (R, 128)

    if rem_rows == 0:
        # Every tile is full; just skip ragged-split overhang steps.
        @pl.when(g < n_tiles)
        def _acc():
            out_ref[...] += per_example[None]
    else:
        # Mask work only on the single partial tile (the last one).
        @pl.when(g < n_tiles - 1)
        def _acc_full():
            out_ref[...] += per_example[None]

        @pl.when(g == n_tiles - 1)
        def _acc_tail():
            # Tail rows of the block are undefined VMEM: NaN-safe select
            # BEFORE accumulation (never a post-hoc subtraction).
            row = lax.broadcasted_iota(jnp.int32, per_example.shape, 0)
            out_ref[...] += jnp.where(row < rem_rows, per_example, 0.0)[None]


def _ce_sum_pallas(logits_3d, labels_2d, *, rows_per_tile: int,
                   num_splits: int):
    """Sum of per-example CE losses for (4, n_rows, 128) class-major logits."""
    _, n_rows, _ = logits_3d.shape

    r_tile = min(max(int(rows_per_tile), 1), n_rows)
    if r_tile < n_rows:
        r_tile = (r_tile // 8) * 8          # (8, 128) block alignment
        if r_tile == 0:
            r_tile = n_rows                 # tiny input: single full block
    n_tiles = _cdiv(n_rows, r_tile)
    rem_rows = n_rows % r_tile              # 0 => no partial tile
    splits = max(1, min(int(num_splits), n_tiles))
    tiles_per_split = _cdiv(n_tiles, splits)

    kernel = functools.partial(
        _ce_sum_kernel, n_tiles=n_tiles, tiles_per_split=tiles_per_split,
        rem_rows=rem_rows)

    def _tile_idx(p, k):
        # Clamp so ragged split assignment never issues an out-of-range DMA;
        # the kernel skips the accumulation for those overhang steps.
        return jnp.minimum(p * tiles_per_split + k, n_tiles - 1)

    partials = pl.pallas_call(
        kernel,
        out_shape=jax.ShapeDtypeStruct((splits, r_tile, LANES), jnp.float32),
        grid_spec=pltpu.PrefetchScalarGridSpec(
            num_scalar_prefetch=0,
            grid=(splits, tiles_per_split),
            in_specs=[
                pl.BlockSpec((NUM_CLASSES, r_tile, LANES),
                             lambda p, k: (0, _tile_idx(p, k), 0)),
                pl.BlockSpec((r_tile, LANES),
                             lambda p, k: (_tile_idx(p, k), 0)),
            ],
            out_specs=pl.BlockSpec((1, r_tile, LANES),
                                   lambda p, k: (p, 0, 0)),
        ),
        compiler_params=pltpu.CompilerParams(
            dimension_semantics=("parallel", "arbitrary")),
    )(logits_3d, labels_2d)
    return jnp.sum(partials)


def _tail_loss_sum(logits_tail, labels_tail):
    """CE-loss sum for a (t, 4) tail slice (t < 128) via fused XLA ops."""
    lg = logits_tail.astype(jnp.float32)
    m = jnp.max(lg, axis=-1, keepdims=True)
    lse = jnp.log(jnp.sum(jnp.exp(lg - m), axis=-1)) + m[:, 0]
    picked = jnp.take_along_axis(
        lg, labels_tail[:, None].astype(jnp.int32), axis=-1)[:, 0]
    return jnp.sum(lse - picked)


def _keep_label_dtype(labels):
    # No wrapper-side astype pass for the common narrow integer dtypes (the
    # kernel widens in-register); only unsupported widths (e.g. int64) pay it.
    if labels.dtype in (jnp.int8, jnp.uint8, jnp.int32, jnp.uint32):
        return labels
    return labels.astype(jnp.int32)


@functools.partial(jax.jit, static_argnames=("rows_per_tile", "num_splits"))
def rotnet_loss(rotation_logits, rotation_labels, *,
                rows_per_tile: int = 1024, num_splits: int = 2):
    """Mean cross-entropy over (n, 4) row-major logits and (n,) int labels.

    Module-compatible entry point.  Pays exactly one HBM relayout
    (row-major -> class-major, fused with the reshape under jit); prefer
    `rotnet_loss_class_major` when the producer can emit (4, n) logits.
    """
    n, c = rotation_logits.shape
    assert c == NUM_CLASSES
    labels = _keep_label_dtype(rotation_labels)

    n_rows = n // LANES
    n_main = n_rows * LANES

    tail = jnp.float32(0.0)
    if n_main < n:
        tail = _tail_loss_sum(rotation_logits[n_main:],
                              rotation_labels[n_main:])
    if n_rows == 0:
        return tail / n

    # Single relayout pass: (n, 4) row-major -> (4, n_rows, 128) class-major.
    logits_3d = jnp.transpose(
        rotation_logits[:n_main].reshape(n_rows, LANES, NUM_CLASSES),
        (2, 0, 1))
    labels_2d = labels[:n_main].reshape(n_rows, LANES)

    main = _ce_sum_pallas(logits_3d, labels_2d,
                          rows_per_tile=rows_per_tile, num_splits=num_splits)
    return (main + tail) / n


@functools.partial(jax.jit, static_argnames=("rows_per_tile", "num_splits"))
def rotnet_loss_class_major(rotation_logits_cn, rotation_labels, *,
                            rows_per_tile: int = 1024, num_splits: int = 2):
    """Mean cross-entropy for class-major (4, n) logits.

    Preferred entry: zero pre-kernel copies when n % 128 == 0 (only a free
    contiguous reshape); one small slice copy otherwise.
    """
    c, n = rotation_logits_cn.shape
    assert c == NUM_CLASSES
    labels = _keep_label_dtype(rotation_labels)

    n_rows = n // LANES
    n_main = n_rows * LANES

    tail = jnp.float32(0.0)
    if n_main < n:
        tail = _tail_loss_sum(rotation_logits_cn[:, n_main:].T,
                              rotation_labels[n_main:])
    if n_rows == 0:
        return tail / n

    logits_3d = rotation_logits_cn[:, :n_main].reshape(
        NUM_CLASSES, n_rows, LANES)          # free bitcast when n_main == n
    labels_2d = labels[:n_main].reshape(n_rows, LANES)

    main = _ce_sum_pallas(logits_3d, labels_2d,
                          rows_per_tile=rows_per_tile, num_splits=num_splits)
    return (main + tail) / n


def _reference_loss(logits, labels):
    logits = logits.astype(jnp.float32)
    lse = jax.scipy.special.logsumexp(logits, axis=-1)
    picked = jnp.take_along_axis(
        logits, labels[:, None].astype(jnp.int32), axis=-1)[:, 0]
    return jnp.mean(lse - picked)


if __name__ == "__main__":
    key = jax.random.PRNGKey(0)
    k1, k2, k3, k4, k5, k6 = jax.random.split(key, 6)

    # Case A: multiple-of-128 batch, single tile; both entry points (the
    # class-major one reads the logits with zero pre-kernel copies).
    n_a = 512
    logits_a = jax.random.normal(k1, (n_a, NUM_CLASSES), dtype=jnp.float32)
    labels_a = jax.random.randint(k2, (n_a,), 0, NUM_CLASSES, dtype=jnp.int32)
    ref_a = _reference_loss(logits_a, labels_a)
    loss_a = jax.block_until_ready(rotnet_loss(logits_a, labels_a))
    assert jnp.allclose(loss_a, ref_a, atol=1e-5, rtol=1e-5), (loss_a, ref_a)
    loss_a_cm = jax.block_until_ready(
        rotnet_loss_class_major(logits_a.T, labels_a))
    assert jnp.allclose(loss_a_cm, ref_a, atol=1e-5, rtol=1e-5), (loss_a_cm, ref_a)

    # Case B: ragged batch (not a multiple of 128), bf16 logits, tiny tiles:
    # exercises multi-tile accumulation, the 2-way parallel split with a
    # clamped/skipped overhang step, the partial-tile row mask, and the
    # sub-128-example tail path.
    n_b = 2765   # 21 full lane-rows (2688 examples) + 77-example tail
    logits_b = jax.random.normal(k3, (n_b, NUM_CLASSES), dtype=jnp.bfloat16)
    labels_b = jax.random.randint(k4, (n_b,), 0, NUM_CLASSES, dtype=jnp.int32)
    ref_b = _reference_loss(logits_b, labels_b)
    loss_b = jax.block_until_ready(
        rotnet_loss(logits_b, labels_b, rows_per_tile=8, num_splits=2))
    assert jnp.allclose(loss_b, ref_b, atol=1e-4, rtol=1e-4), (loss_b, ref_b)

    # Case C: tiny batch (< 128): pure fused-XLA fallback (no kernel launch).
    n_c = 8
    logits_c = jax.random.normal(k5, (n_c, NUM_CLASSES), dtype=jnp.float32)
    labels_c = jax.random.randint(k6, (n_c,), 0, NUM_CLASSES, dtype=jnp.int32)
    ref_c = _reference_loss(logits_c, labels_c)
    loss_c = jax.block_until_ready(rotnet_loss(logits_c, labels_c))
    assert jnp.allclose(loss_c, ref_c, atol=1e-5, rtol=1e-5), (loss_c, ref_c)

    print("KERNEL_OK")
</pallas_src>

<mosaic_0001>
module attributes {stable_mosaic.version = 11 : i64} {
  func.func @_ce_sum_kernel(%arg0: i32, %arg1: i32, %arg2: memref<4x4x128xf32, #tpu.memory_space<vmem>>, %arg3: memref<4x128xi32, #tpu.memory_space<vmem>>, %arg4: memref<1x4x128xf32, #tpu.memory_space<vmem>>) attributes {dimension_semantics = [#tpu.dimension_semantics<parallel>, #tpu.dimension_semantics<arbitrary>], iteration_bounds = array<i64: 1, 1>, scalar_prefetch = 0 : i64, scratch_operands = 0 : i64, tpu.core_type = #tpu.core_type<tc>, window_params = [{transform_indices = @transform_0, window_bounds = array<i64: 4, 4, 128>}, {transform_indices = @transform_1, window_bounds = array<i64: 4, 128>}, {transform_indices = @transform_2, window_bounds = array<i64: 1, 4, 128>}]} {
    %c1_i32 = arith.constant 1 : i32
    %0 = arith.muli %arg0, %c1_i32 : i32
    %1 = arith.addi %0, %arg1 : i32
    %c0_i32 = arith.constant 0 : i32
    %2 = arith.cmpi eq, %arg1, %c0_i32 : i32
    %3 = arith.extui %2 : i1 to i32
    %c0_i32_0 = arith.constant 0 : i32
    %4 = arith.cmpi ne, %3, %c0_i32_0 : i32
    scf.if %4 {
      %cst = arith.constant 0.000000e+00 : f32
      %43 = vector.broadcast %cst : f32 to vector<1x4x128xf32>
      %c0_9 = arith.constant 0 : index
      %c0_10 = arith.constant 0 : index
      %c0_11 = arith.constant 0 : index
      %44 = vector.load %arg4[%c0_9, %c0_10, %c0_11] : memref<1x4x128xf32, #tpu.memory_space<vmem>>, vector<1x4x128xf32>
      tpu.vector_store %arg4[%c0_9, %c0_10, %c0_11], %43 {strides = array<i32>} : memref<1x4x128xf32, #tpu.memory_space<vmem>>, vector<1x4x128xf32>,
    } else {
    }
    %c0 = arith.constant 0 : index
    %c0_1 = arith.constant 0 : index
    %c0_2 = arith.constant 0 : index
    %5 = vector.load %arg2[%c0, %c0_1, %c0_2] : memref<4x4x128xf32, #tpu.memory_space<vmem>>, vector<4x4x128xf32>
    %c0_3 = arith.constant 0 : index
    %c0_4 = arith.constant 0 : index
    %6 = vector.load %arg3[%c0_3, %c0_4] : memref<4x128xi32, #tpu.memory_space<vmem>>, vector<4x128xi32>
    %7 = vector.extract_strided_slice %5 {offsets = [0, 0, 0], sizes = [1, 4, 128], strides = [1, 1, 1]} : vector<4x4x128xf32> to vector<1x4x128xf32>
    %8 = vector.shape_cast %7 : vector<1x4x128xf32> to vector<4x128xf32>
    %9 = vector.extract_strided_slice %5 {offsets = [1, 0, 0], sizes = [1, 4, 128], strides = [1, 1, 1]} : vector<4x4x128xf32> to vector<1x4x128xf32>
    %10 = vector.shape_cast %9 : vector<1x4x128xf32> to vector<4x128xf32>
    %11 = vector.extract_strided_slice %5 {offsets = [2, 0, 0], sizes = [1, 4, 128], strides = [1, 1, 1]} : vector<4x4x128xf32> to vector<1x4x128xf32>
    %12 = vector.shape_cast %11 : vector<1x4x128xf32> to vector<4x128xf32>
    %13 = vector.extract_strided_slice %5 {offsets = [3, 0, 0], sizes = [1, 4, 128], strides = [1, 1, 1]} : vector<4x4x128xf32> to vector<1x4x128xf32>
    %14 = vector.shape_cast %13 : vector<1x4x128xf32> to vector<4x128xf32>
    %15 = arith.maximumf %8, %10 : vector<4x128xf32>
    %16 = arith.maximumf %12, %14 : vector<4x128xf32>
    %17 = arith.maximumf %15, %16 : vector<4x128xf32>
    %18 = arith.subf %8, %17 : vector<4x128xf32>
    %19 = arith.subf %10, %17 : vector<4x128xf32>
    %20 = arith.subf %12, %17 : vector<4x128xf32>
    %21 = arith.subf %14, %17 : vector<4x128xf32>
    %22 = math.exp %18 : vector<4x128xf32>
    %23 = math.exp %19 : vector<4x128xf32>
    %24 = arith.addf %22, %23 : vector<4x128xf32>
    %25 = math.exp %20 : vector<4x128xf32>
    %26 = arith.addf %24, %25 : vector<4x128xf32>
    %27 = math.exp %21 : vector<4x128xf32>
    %28 = arith.addf %26, %27 : vector<4x128xf32>
    %c0_i32_5 = arith.constant 0 : i32
    %29 = vector.broadcast %c0_i32_5 : i32 to vector<4x128xi32>
    %30 = arith.cmpi eq, %6, %29 : vector<4x128xi32>
    %c1_i32_6 = arith.constant 1 : i32
    %31 = vector.broadcast %c1_i32_6 : i32 to vector<4x128xi32>
    %32 = arith.cmpi eq, %6, %31 : vector<4x128xi32>
    %c2_i32 = arith.constant 2 : i32
    %33 = vector.broadcast %c2_i32 : i32 to vector<4x128xi32>
    %34 = arith.cmpi eq, %6, %33 : vector<4x128xi32>
    %35 = arith.select %34, %20, %21 : vector<4x128xi1>, vector<4x128xf32>
    %36 = arith.select %32, %19, %35 : vector<4x128xi1>, vector<4x128xf32>
    %37 = arith.select %30, %18, %36 : vector<4x128xi1>, vector<4x128xf32>
    %38 = math.log %28 : vector<4x128xf32>
    %39 = arith.subf %38, %37 : vector<4x128xf32>
    %c1_i32_7 = arith.constant 1 : i32
    %40 = arith.cmpi slt, %1, %c1_i32_7 : i32
    %41 = arith.extui %40 : i1 to i32
    %c0_i32_8 = arith.constant 0 : i32
    %42 = arith.cmpi ne, %41, %c0_i32_8 : i32
    scf.if %42 {
      %c0_9 = arith.constant 0 : index
      %c0_10 = arith.constant 0 : index
      %c0_11 = arith.constant 0 : index
      %43 = vector.load %arg4[%c0_9, %c0_10, %c0_11] : memref<1x4x128xf32, #tpu.memory_space<vmem>>, vector<1x4x128xf32>
      %44 = vector.shape_cast %39 : vector<4x128xf32> to vector<1x4x128xf32>
      %45 = arith.addf %43, %44 : vector<1x4x128xf32>
      %c0_12 = arith.constant 0 : index
      %c0_13 = arith.constant 0 : index
      %c0_14 = arith.constant 0 : index
      %46 = vector.load %arg4[%c0_12, %c0_13, %c0_14] : memref<1x4x128xf32, #tpu.memory_space<vmem>>, vector<1x4x128xf32>
      tpu.vector_store %arg4[%c0_12, %c0_13, %c0_14], %45 {strides = array<i32>} : memref<1x4x128xf32, #tpu.memory_space<vmem>>, vector<1x4x128xf32>,
    } else {
    }
    return
  }
  func.func @transform_0(%arg0: i32, %arg1: i32) -> (i32, i32, i32) {
    %c1_i32 = arith.constant 1 : i32
    %0 = arith.muli %arg0, %c1_i32 : i32
    %1 = arith.addi %0, %arg1 : i32
    %c0_i32 = arith.constant 0 : i32
    %2 = arith.minsi %1, %c0_i32 : i32
    %c0_i32_0 = arith.constant 0 : i32
    %c0_i32_1 = arith.constant 0 : i32
    %c0_i32_2 = arith.constant 0 : i32
    return %c0_i32_0, %2, %c0_i32_1 : i32, i32, i32
  }
  func.func @transform_1(%arg0: i32, %arg1: i32) -> (i32, i32) {
    %c1_i32 = arith.constant 1 : i32
    %0 = arith.muli %arg0, %c1_i32 : i32
    %1 = arith.addi %0, %arg1 : i32
    %c0_i32 = arith.constant 0 : i32
    %2 = arith.minsi %1, %c0_i32 : i32
    %c0_i32_0 = arith.constant 0 : i32
    %c0_i32_1 = arith.constant 0 : i32
    return %2, %c0_i32_0 : i32, i32
  }
  func.func @transform_2(%arg0: i32, %arg1: i32) -> (i32, i32, i32) {
    %c0_i32 = arith.constant 0 : i32
    %c0_i32_0 = arith.constant 0 : i32
    %c0_i32_1 = arith.constant 0 : i32
    return %arg0, %c0_i32, %c0_i32_0 : i32, i32, i32
  }
}

</mosaic_0001>

<bundles_post_ra>
// kernel: rotnet_loss.1
= control target key start
LH: loop header
LB: loop body
LE: loop exit
PB: predicated region body
PF: predicated region fallthrough
CT: control target
= control target key end

     0   :  { %v137_v0 = vmov 0.0   ;;  %s177_s2 = inlined_call_operand.vmem [shape: f32[1,4,128], index: 2, kind: output, shape index: {}]   ;;  %s178_s0 = inlined_call_operand.vmem [shape: f32[4,4,128], index: 0, kind: input, shape index: {}]   ;;  %s179_s1 = inlined_call_operand.vmem [shape: s32[4,128], index: 1, kind: input, shape index: {}]  }
   0x1   :  { %70 = vst [vmem:[%s177_s2] sm:$0xf] %v137_v0  ;;  %v71_v1 = vld [vmem:[%s178_s0] sm:$0xf]  ;;  %v72_v2 = vld [vmem:[%s178_s0 + $0x4] sm:$0xf] }
   0x2   :  { %v73_v3 = vld [vmem:[%s178_s0 + $0x8] sm:$0xf]  ;;  %v74_v4 = vld [vmem:[%s178_s0 + $0xc] sm:$0xf]  ;;  %v76_v5 = vmax.f32 %v71_v1, %v72_v2  ;;  %v75_v19 = vld [vmem:[%s179_s1] sm:$0xf] }
   0x3   :  { %v77_v6 = vmax.f32 %v73_v3, %v74_v4  ;;  %vm96_vm0 = vcmp.eq.s32.totalorder %v75_v19, 2  ;;  %vm95_vm1 = vcmp.eq.s32.totalorder %v75_v19, 1  ;;  %vm94_vm2 = vcmp.eq.s32.totalorder %v75_v19, 0 }
   0x5   :  { %v78_v7 = vmax.f32 %v76_v5, %v77_v6 }
   0x7   :  { %v79_v8 = vsub.f32 %v71_v1, %v78_v7  ;;  %v80_v9 = vsub.f32 %v72_v2, %v78_v7  ;;  %v81_v10 = vsub.f32 %v73_v3, %v78_v7  ;;  %v82_v11 = vsub.f32 %v74_v4, %v78_v7 }
   0x8   :  { %v107_v29 = vld [vmem:[%s177_s2] sm:$0xf] }
   0x9   :  { %v83_v12 = vmul.f32 1.442695, %v79_v8  ;;  %v85_v13 = vmul.f32 1.442695, %v80_v9  ;;  %v88_v14 = vmul.f32 1.442695, %v81_v10  ;;  %v97_v24 = vsel %vm96_vm0, %v81_v10, %v82_v11 }
   0xa   :  { %v91_v15 = vmul.f32 1.442695, %v82_v11  ;;  %v98_v25 = vsel %vm95_vm1, %v80_v9, %v97_v24 }
   0xb   :  { %127 = vpow2.f32 %v83_v12  ;;  %v99_v27 = vsel %vm94_vm2, %v79_v8, %v98_v25 }
   0xc   :  { %129 = vpow2.f32 %v85_v13 }
   0xd   :  { %131 = vpow2.f32 %v88_v14 }
   0xe   :  { %133 = vpow2.f32 %v91_v15 }
  0x11   :  { %v128_v16 = vpop.eup %127 }
  0x12   :  { %v130_v17 = vpop.eup %129 }
  0x13   :  { %v132_v18 = vpop.eup %131  ;;  %v87_v20 = vadd.f32 %v130_v17, %v128_v16 }
  0x14   :  { %v134_v21 = vpop.eup %133 }
  0x15   :  { %v90_v22 = vadd.f32 %v132_v18, %v87_v20 }
  0x17   :  { %v93_v23 = vadd.f32 %v134_v21, %v90_v22 }
  0x19   :  { %135 = vlog2.f32 %v93_v23 }
  0x1f   :  { %v136_v26 = vpop.eup %135 }
  0x20   :  { %v101_v28 = vmul.f32 0.6931472, %v136_v26 }
  0x22   :  { %v102_v30 = vsub.f32 %v101_v28, %v99_v27 }
  0x24   :  { %v108_v31 = vadd.f32 %v107_v29, %v102_v30 }
  0x26   :  { %109 = vst [vmem:[%s177_s2] sm:$0xf] %v108_v31 }

</bundles_post_ra>
